<compile_context>
chip_gen: v7x
topology: tpu7x:2x2x1
jax: 0.10.0
libtpu: 0.0.40
codegen_flags: <defaults>
</compile_context>

<pallas_src>
import jax
import jax.numpy as jnp
from jax import lax
from jax.experimental import pallas as pl
from jax.experimental.pallas import tpu as pltpu  # noqa: F401  (TPU backend)

BN_EPS = 1e-5


# ----------------------------------------------------------------------------
# Production forward path: the module returns x unchanged, so the fastest
# correct implementation does no work at all (per perf review, the previous
# pallas_call paid a launch + full x copy + dead (N, C) BN writeback).
# ----------------------------------------------------------------------------
def mymodule1_forward(x):
    """Exact forward semantics of MyModule1: identity (BN result discarded)."""
    return x


# ----------------------------------------------------------------------------
# Validation-only kernel: the batch_norm the PyTorch module computes and then
# throws away.  Channel-major (C, N) layout so the output's last dim (N) is a
# multiple of 128 -> unmasked, lane-dense stores.
# ----------------------------------------------------------------------------
def _bn_train_kernel(xt_ref, gb_ref, bn_ref):
    # xt_ref: (C, N) f32-castable, channel-major (N on the 128-lane axis).
    # gb_ref: (C, 2) packed [gamma | beta].
    xt = xt_ref[...].astype(jnp.float32)                      # f32 reductions
    inv_n = 1.0 / xt.shape[1]
    mean = jnp.sum(xt, axis=1, keepdims=True) * inv_n         # (C, 1)
    xc = xt - mean
    var = jnp.sum(xc * xc, axis=1, keepdims=True) * inv_n     # (C, 1) two-pass (stable)
    gamma = gb_ref[:, 0:1].astype(jnp.float32)                # (C, 1)
    beta = gb_ref[:, 1:2].astype(jnp.float32)                 # (C, 1)
    scale = gamma * lax.rsqrt(var + BN_EPS)                   # folded affine
    bn_ref[...] = (xc * scale + beta).astype(bn_ref.dtype)    # lane-dense store


def pack_affine(weight, bias):
    """Pack gamma/beta once into a single (C, 2) tile -> one BlockSpec / DMA."""
    return jnp.stack([weight, bias], axis=1)


@jax.jit
def mymodule1_batch_norm(x, gb):
    """Validation path only.  x: (N, C) as in PyTorch; internally channel-major
    (C, N) for lane-dense output stores.  The transposes are layout plumbing
    and live only on this (non-production) path.

    For generalized (large N, C) BN this would grid-tile the N axis with a
    VMEM sum/sumsq accumulator across an 'arbitrary' axis (v7x VMEM is 64 MiB),
    but at validation sizes the whole-array block is optimal.
    """
    n, c = x.shape
    xt = x.T                                                   # (C, N)
    bn_t = pl.pallas_call(
        _bn_train_kernel,
        out_shape=jax.ShapeDtypeStruct((c, n), jnp.float32),
        in_specs=[
            pl.BlockSpec((c, n), lambda: (0, 0)),
            pl.BlockSpec((c, 2), lambda: (0, 0)),
        ],
        out_specs=pl.BlockSpec((c, n), lambda: (0, 0)),
    )(xt, gb)
    return bn_t.T                                              # back to (N, C)


def reference_batch_norm(x, weight, bias):
    mean = jnp.mean(x, axis=0, keepdims=True)
    var = jnp.mean((x - mean) ** 2, axis=0, keepdims=True)     # biased, training mode
    return weight * (x - mean) / jnp.sqrt(var + BN_EPS) + bias


if __name__ == "__main__":
    # Module parameters (torch.ones(3)/torch.zeros(3)) imply C = 3 channels.
    # N = 256 (multiple of 128) so the (C, N) BN output is lane-dense.
    batch, channels = 256, 3
    key = jax.random.PRNGKey(0)
    x = jax.random.normal(key, (batch, channels), jnp.float32)
    weight = jnp.ones((channels,), jnp.float32)   # self.weight = torch.ones(3)
    bias = jnp.zeros((channels,), jnp.float32)    # self.bias = torch.zeros(3)
    gb = pack_affine(weight, bias)                # built once, not per call

    # Forward output must equal x exactly (module returns its input unchanged).
    out = jax.block_until_ready(mymodule1_forward(x))
    assert out.shape == x.shape
    assert jnp.array_equal(out, x)

    # Run the validation kernel once: the BN the PyTorch module computes and
    # discards.  Compare against a pure-JAX reference.
    bn = jax.block_until_ready(mymodule1_batch_norm(x, gb))
    ref = reference_batch_norm(x, weight, bias)
    assert bn.shape == x.shape
    assert jnp.allclose(bn, ref, atol=1e-4, rtol=1e-4)

    print("KERNEL_OK")
</pallas_src>

<mosaic_0001>
module attributes {stable_mosaic.version = 11 : i64} {
  func.func @_bn_train_kernel(%arg0: memref<3x256xf32, #tpu.memory_space<vmem>>, %arg1: memref<3x2xf32, #tpu.memory_space<vmem>>, %arg2: memref<3x256xf32, #tpu.memory_space<vmem>>) attributes {dimension_semantics = [], scalar_prefetch = 0 : i64, scratch_operands = 0 : i64, tpu.core_type = #tpu.core_type<tc>} {
    %c0 = arith.constant 0 : index
    %c0_0 = arith.constant 0 : index
    %0 = vector.load %arg0[%c0, %c0_0] : memref<3x256xf32, #tpu.memory_space<vmem>>, vector<3x256xf32>
    %cst = arith.constant dense<0.000000e+00> : vector<3xf32>
    %1 = vector.multi_reduction <add>, %0, %cst [1] : vector<3x256xf32> to vector<3xf32>
    %2 = vector.shape_cast %1 : vector<3xf32> to vector<3x1xf32>
    %cst_1 = arith.constant 3.906250e-03 : f32
    %3 = vector.broadcast %cst_1 : f32 to vector<3x1xf32>
    %4 = arith.mulf %2, %3 : vector<3x1xf32>
    %5 = vector.broadcast %4 : vector<3x1xf32> to vector<3x256xf32>
    %6 = arith.subf %0, %5 : vector<3x256xf32>
    %7 = arith.mulf %6, %6 : vector<3x256xf32>
    %cst_2 = arith.constant dense<0.000000e+00> : vector<3xf32>
    %8 = vector.multi_reduction <add>, %7, %cst_2 [1] : vector<3x256xf32> to vector<3xf32>
    %9 = vector.shape_cast %8 : vector<3xf32> to vector<3x1xf32>
    %cst_3 = arith.constant 3.906250e-03 : f32
    %10 = vector.broadcast %cst_3 : f32 to vector<3x1xf32>
    %11 = arith.mulf %9, %10 : vector<3x1xf32>
    %c0_4 = arith.constant 0 : index
    %c0_5 = arith.constant 0 : index
    %12 = vector.load %arg1[%c0_4, %c0_5] : memref<3x2xf32, #tpu.memory_space<vmem>>, vector<3x1xf32>
    %c0_6 = arith.constant 0 : index
    %c1 = arith.constant 1 : index
    %13 = vector.load %arg1[%c0_6, %c1] : memref<3x2xf32, #tpu.memory_space<vmem>>, vector<3x1xf32>
    %cst_7 = arith.constant 9.99999974E-6 : f32
    %14 = vector.broadcast %cst_7 : f32 to vector<3x1xf32>
    %15 = arith.addf %11, %14 : vector<3x1xf32>
    %16 = math.rsqrt %15 : vector<3x1xf32>
    %17 = arith.mulf %12, %16 : vector<3x1xf32>
    %18 = vector.broadcast %17 : vector<3x1xf32> to vector<3x256xf32>
    %19 = arith.mulf %6, %18 : vector<3x256xf32>
    %20 = vector.broadcast %13 : vector<3x1xf32> to vector<3x256xf32>
    %21 = arith.addf %19, %20 : vector<3x256xf32>
    %c0_8 = arith.constant 0 : index
    %c0_9 = arith.constant 0 : index
    %22 = vector.load %arg2[%c0_8, %c0_9] : memref<3x256xf32, #tpu.memory_space<vmem>>, vector<3x256xf32>
    tpu.vector_store %arg2[%c0_8, %c0_9], %21 {strides = array<i32>} : memref<3x256xf32, #tpu.memory_space<vmem>>, vector<3x256xf32>,
    return
  }
}

</mosaic_0001>

<bundles_post_ra>
// kernel: mymodule1_batch_norm.1
= control target key start
LH: loop header
LB: loop body
LE: loop exit
PB: predicated region body
PF: predicated region fallthrough
CT: control target
= control target key end

     0   :  { %vm16_vm0 = vcmask 1042432   ;;  %s163_s0 = inlined_call_operand.vmem [shape: f32[3,256], index: 0, kind: input, shape index: {}]   ;;  %s164_s1 = inlined_call_operand.vmem [shape: f32[3,2], index: 1, kind: input, shape index: {}]   ;;  %s165_s2 = inlined_call_operand.hbm [shape: f32[3,256], index: 2, kind: output, shape index: {}]  }
   0x1   :  { %v12_v0 = vld [vmem:[%s163_s0] sm:$0x77] }
   0x2   :  { %v14_v1 = vcombine.high %v12_v0, %v12_v0  ;;  %v17_v2 = vsel %vm16_vm0, %v12_v0, 0.0 }
   0x3   :  { %7 = vsyncpa [#allocation3], 0  ;;  %v122_v5 = vmov 839922192   ;;  %v27_v7 = vlaneseq  ;;  %v123_v20 = vmov 0   ;;  %v124_v21 = vmov 1  }
   0x4   :  { %v18_v3 = vsel %vm16_vm0, %v14_v1, 0.0  ;;  %v25_v6 = vunpack.c.l.s4 %v122_v5  ;;  %92 = vset.pattern.permute.xlu1 %v123_v20  ;;  %94 = vset.pattern.permute.xlu0 %v124_v21  ;;  %v43_v25 = vld [vmem:[%s164_s1] sm:$0x7]  ;;  %s125_s12 = smov [#allocation2]  }
   0x5   :  { %v19_v4 = vadd.f32 %v18_v3, %v17_v2  ;;  %v28_v9 = vshrl.u32 %v27_v7, 7  ;;  %s80_s13 = sshll.u32 %s125_s12, 4  ;;  %s81_s13 = int_to_ptr.vmem [resolvable:$true] %s80_s13 }
   0x6   :  { %v26_v8 = vunpack.c.0.s8 %v25_v6  ;;  %s98_s14 = scalar_lea.vmem %s81_s13, 128  ;;  %p103_p1 = scmp.lt.s32.totalorder %s81_s13, %s81_s13 }
   0x7   :  { %20 = vadd.xlane.f32.xlu0 %v19_v4  ;;  %p99_p0 = scmp.ne.s32.totalorder %s81_s13, %s98_s14  ;;  %p104_p2 = scmp.lt.s32.totalorder %s98_s14, %s98_s14 }
   0x8   :  { %v29_v10 = vsub.s32 %v26_v8, %v28_v9 }
   0x9   :  { %p105_p3 = por %p104_p2, %p103_p1 }
   0xb   :  { %p106_p4 = pnand %p105_p3, %p99_p0 }
  0x94   :  { %v21_v11 = vpop.xlane.xlu0 %20 }
  0x95   :  { %v22_v12 = vmul.f32 0.00390625, %v21_v11 }
  0x97   :  { %v30_v13 = vrot.slane %v22_v12, %v29_v10 }
  0x99   :  { %v32_v14 = vsub.f32 %v12_v0, %v30_v13 }
  0x9b   :  { %v33_v15 = vmul.f32 %v32_v14, %v32_v14 }
  0x9d   :  { %v35_v16 = vcombine.high %v33_v15, %v33_v15  ;;  %v37_v17 = vsel %vm16_vm0, %v33_v15, 0.0 }
  0x9f   :  { %v38_v18 = vsel %vm16_vm0, %v35_v16, 0.0 }
  0xa0   :  { %v39_v19 = vadd.f32 %v38_v18, %v37_v17 }
  0xa2   :  { %40 = vadd.xlane.f32.xlu0 %v39_v19 }
 0x12f   :  { %v41_v22 = vpop.xlane.xlu0 %40 }
 0x130   :  { %v42_v23 = vmul.f32 0.00390625, %v41_v22 }
 0x132   :  { %v44_v24 = vadd.f32 1e-05, %v42_v23 }
 0x134   :  { %96 = vrsqrt.f32 %v44_v24 }
 0x13e   :  { %v97_v26 = vpop.eup %96 }
 0x13f   :  { %v46_v27 = vmul.f32 %v97_v26, %v43_v25 }
 0x141   :  { %49 = vperm.xlu1 %92, %v46_v27  }
 0x145   :  { %93 = vset.pattern.permute.xlu1 %v124_v21 }
 0x146   :  { %62 = vperm.xlu1 %93, %v43_v25  }
 0x1c0   :  { %v50_v28 = vpop.permute.xlu1 %49 }
 0x1c1   :  { %v57_v29 = vrot.slane %v50_v28, %v29_v10 }
 0x1c3   :  { %v59_v31 = vmul.f32 %v57_v29, %v32_v14 }
 0x1c5   :  { %v63_v30 = vpop.permute.xlu1 %62 }
 0x1c6   :  { %v70_v32 = vrot.slane %v63_v30, %v29_v10 }
 0x1c8   :  { %v72_v33 = vadd.f32 %v70_v32, %v59_v31 }
 0x1ca   :  { %73 = vst [vmem:[#allocation2] sm:$0x77] %v72_v33 }
 0x1cb   :  { %109 = shalt.err (!%p106_p4)
}
 0x1cc   :  { %s110_s16 = scalar_lea.hbm %s165_s2, 128 }
 0x1cd   :  { %p111_p5 = scmp.ne.s32.totalorder %s165_s2, %s110_s16  ;;  %p114_p6 = scmp.lt.u32.totalorder %s110_s16, %s165_s2 }
 0x1cf   :  { %p116_p7 = pnand %p114_p6, %p111_p5 }
 0x1d1   :  { %119 = shalt.err (!%p116_p7)
}
 0x1d2   :  { %83 = dma.vmem_to_hbm [thread:$0]  %s81_s13, 128, %s165_s2, [#allocation3]  }
 0x1d3   :  { %120 = dma.done.wait [#allocation3], 128  }
 0x1d4   :  { %121 = vsyncadd [#allocation3], 4294967168 }
 0x1d5   :  { %87 = vsyncpa [#allocation3], 1 }

</bundles_post_ra>
